<compile_context>
chip_gen: v5e
topology: v5e:2x2
jax: 0.10.0
libtpu: 0.0.40
codegen_flags: <defaults>
</compile_context>

<pallas_src>
import jax
import jax.numpy as jnp
from jax.experimental import pallas as pl
from jax.experimental.pallas import tpu as pltpu

_LANES = 128


def _simple_gate_kernel(*refs):
    """refs = (chunk_0, ..., chunk_{r-1}, out); every block is (1, S, 128)."""
    o_ref = refs[-1]
    out = refs[0][...]
    for chunk_ref in refs[1:-1]:
        out = out * chunk_ref[...]
    o_ref[...] = out


def _vmem_capacity_bytes():
    """Per-core VMEM capacity; fall back to the most constrained current
    generation (v7x: 64 MiB per TensorCore) if the query is unavailable."""
    try:
        info = pltpu.get_tpu_info()
        cap = getattr(info, "vmem_capacity_bytes", None)
        if cap:
            return int(cap)
    except Exception:
        pass
    return 64 * 1024 * 1024


def _choose_tiling(m, itemsize, r):
    """Pick (sublane block S, padded flat length m_pad, vmem_limit_bytes).

    The flat chunk of m elements is folded to (m_pad // 128, 128); blocks of
    (1, S, 128) are contiguous in HBM and sized by a byte budget derived from
    the per-generation VMEM capacity (double-buffered working set <= half
    VMEM, capped at 48 MiB -> ~5-8 MiB per input block for r=2).
    """
    cap = _vmem_capacity_bytes()
    ws_budget = min(cap // 2, 48 * 1024 * 1024)          # v7x: 32 MiB, v5e/v6e: 48 MiB
    per_block_budget = max(ws_budget // (2 * (r + 1)), 256 * 1024)

    # Sublane quantum for dense vreg packing: f32 -> 8, bf16 -> 16, int8 -> 32.
    q = max(8, 32 // max(1, min(itemsize, 4)))
    row_bytes = _LANES * itemsize

    # Pad the flat chunk length to a lane multiple only when necessary.
    m_pad = ((m + _LANES - 1) // _LANES) * _LANES
    s_total = m_pad // _LANES

    s_cap = max(q, (per_block_budget // row_bytes) // q * q)
    if s_total <= s_cap:
        s = s_total                       # whole chunk in one block (full dim: legal)
        # If that single block is big enough to matter, split it so the grid
        # has >= 2 independent steps (pipelining + both v7x TensorCores).
        if s_total * row_bytes >= (1 << 20) and s_total > 2 * q:
            s = max(q, (((s_total + 1) // 2) + q - 1) // q * q)
    else:
        s = s_cap                         # multiple of q; ragged edge is masked

    ws_bytes = (r + 1) * 2 * s * row_bytes
    vmem_limit = int(min(cap * 3 // 4, max(2 * ws_bytes, 32 * 1024 * 1024)))
    return s, m_pad, vmem_limit


def simple_gate(x, reduction_factor=2):
    """SimpleGate forward: chunk x along the channel dim and multiply chunks.

    x: (N, C, H, W) array (NCHW, same as the PyTorch module).
    returns: (N, C // reduction_factor, H, W) array of the same dtype.
    """
    n, c, h, w = x.shape
    r = int(reduction_factor)
    assert c % r == 0, "reduction_factor must evenly divide channels"
    c_out = c // r
    hw = h * w
    m = c_out * hw
    itemsize = jnp.dtype(x.dtype).itemsize

    s, m_pad, vmem_limit = _choose_tiling(m, itemsize, r)

    # (N, C, H, W) -> (N*r, c_out*H*W): chunk i of batch b is the contiguous
    # row b*r + i (torch.chunk along dim=1), so this reshape is free.
    x_flat = x.reshape(n * r, m)
    if m_pad != m:
        # TODO(synk): rare fallback when c_out*H*W is not a 128 multiple; the
        # pad/slice costs an extra HBM round trip — prefer fusing upstream.
        x_flat = jnp.pad(x_flat, ((0, 0), (0, m_pad - m)))

    s_total = m_pad // _LANES
    x_fold = x_flat.reshape(n * r, s_total, _LANES)   # free reshape (contiguous)

    grid = (n, pl.cdiv(s_total, s))

    in_specs = [
        pl.BlockSpec((1, s, _LANES), lambda b, j, i=i: (b * r + i, j, 0))
        for i in range(r)
    ]
    out_spec = pl.BlockSpec((1, s, _LANES), lambda b, j: (b, j, 0))

    cost = pl.CostEstimate(
        flops=n * m * max(r - 1, 0),
        transcendentals=0,
        bytes_accessed=(n * c * hw + n * m) * itemsize,
    )

    out_fold = pl.pallas_call(
        _simple_gate_kernel,
        out_shape=jax.ShapeDtypeStruct((n, s_total, _LANES), x.dtype),
        grid_spec=pltpu.PrefetchScalarGridSpec(
            num_scalar_prefetch=0,
            grid=grid,
            in_specs=in_specs,
            out_specs=out_spec,
        ),
        compiler_params=pltpu.CompilerParams(
            dimension_semantics=("parallel", "parallel"),
            vmem_limit_bytes=vmem_limit,
        ),
        cost_estimate=cost,
    )(*([x_fold] * r))

    out_flat = out_fold.reshape(n, m_pad)
    if m_pad != m:
        out_flat = out_flat[:, :m]
    return out_flat.reshape(n, c_out, h, w)


if __name__ == "__main__":
    key = jax.random.PRNGKey(0)
    # Small shapes consistent with NAFNet-style NCHW inputs.
    x = jax.random.normal(key, (2, 4, 16, 16), dtype=jnp.float32)

    out = simple_gate(x, reduction_factor=2)
    out = jax.block_until_ready(out)

    # Reference check (plain JAX) of chunk-and-multiply semantics.
    ref = x[:, :2] * x[:, 2:]
    assert out.shape == (2, 2, 16, 16)
    assert jnp.allclose(out, ref, atol=1e-6), "mismatch vs reference"

    print("KERNEL_OK")
</pallas_src>

<mosaic_0001>
module attributes {stable_mosaic.version = 11 : i64} {
  func.func @_simple_gate_kernel(%arg0: i32, %arg1: i32, %arg2: memref<1x4x128xf32, #tpu.memory_space<vmem>>, %arg3: memref<1x4x128xf32, #tpu.memory_space<vmem>>, %arg4: memref<1x4x128xf32, #tpu.memory_space<vmem>>) attributes {dimension_semantics = [#tpu.dimension_semantics<parallel>, #tpu.dimension_semantics<parallel>], iteration_bounds = array<i64: 2, 1>, scalar_prefetch = 0 : i64, scratch_operands = 0 : i64, tpu.core_type = #tpu.core_type<tc>, window_params = [{transform_indices = @transform_0, window_bounds = array<i64: 1, 4, 128>}, {transform_indices = @transform_1, window_bounds = array<i64: 1, 4, 128>}, {transform_indices = @transform_2, window_bounds = array<i64: 1, 4, 128>}]} {
    %c0 = arith.constant 0 : index
    %c0_0 = arith.constant 0 : index
    %c0_1 = arith.constant 0 : index
    %0 = vector.load %arg2[%c0, %c0_0, %c0_1] : memref<1x4x128xf32, #tpu.memory_space<vmem>>, vector<1x4x128xf32>
    %c0_2 = arith.constant 0 : index
    %c0_3 = arith.constant 0 : index
    %c0_4 = arith.constant 0 : index
    %1 = vector.load %arg3[%c0_2, %c0_3, %c0_4] : memref<1x4x128xf32, #tpu.memory_space<vmem>>, vector<1x4x128xf32>
    %2 = arith.mulf %0, %1 : vector<1x4x128xf32>
    %c0_5 = arith.constant 0 : index
    %c0_6 = arith.constant 0 : index
    %c0_7 = arith.constant 0 : index
    %3 = vector.load %arg4[%c0_5, %c0_6, %c0_7] : memref<1x4x128xf32, #tpu.memory_space<vmem>>, vector<1x4x128xf32>
    tpu.vector_store %arg4[%c0_5, %c0_6, %c0_7], %2 {strides = array<i32>} : memref<1x4x128xf32, #tpu.memory_space<vmem>>, vector<1x4x128xf32>,
    return
  }
  func.func @transform_0(%arg0: i32, %arg1: i32) -> (i32, i32, i32) {
    %c2_i32 = arith.constant 2 : i32
    %0 = arith.muli %arg0, %c2_i32 : i32
    %c0_i32 = arith.constant 0 : i32
    %1 = arith.addi %0, %c0_i32 : i32
    %c0_i32_0 = arith.constant 0 : i32
    %c0_i32_1 = arith.constant 0 : i32
    return %1, %arg1, %c0_i32_0 : i32, i32, i32
  }
  func.func @transform_1(%arg0: i32, %arg1: i32) -> (i32, i32, i32) {
    %c2_i32 = arith.constant 2 : i32
    %0 = arith.muli %arg0, %c2_i32 : i32
    %c1_i32 = arith.constant 1 : i32
    %1 = arith.addi %0, %c1_i32 : i32
    %c0_i32 = arith.constant 0 : i32
    %c0_i32_0 = arith.constant 0 : i32
    return %1, %arg1, %c0_i32 : i32, i32, i32
  }
  func.func @transform_2(%arg0: i32, %arg1: i32) -> (i32, i32, i32) {
    %c0_i32 = arith.constant 0 : i32
    %c0_i32_0 = arith.constant 0 : i32
    return %arg0, %arg1, %c0_i32 : i32, i32, i32
  }
}

</mosaic_0001>

<bundles_post_ra>
// kernel: tpu_custom_call.1
= control target key start
LH: loop header
LB: loop body
LE: loop exit
PB: predicated region body
PF: predicated region fallthrough
CT: control target
= control target key end

     0   :  { %s930_s0 = inlined_call_operand.hbm [shape: f32[4,4,128], index: 0, kind: input, shape index: {}]   ;;  %s931_s1 = inlined_call_operand.hbm [shape: f32[4,4,128], index: 1, kind: input, shape index: {}]   ;;  %s932_s2 = inlined_call_operand.hbm [shape: f32[2,4,128], index: 2, kind: output, shape index: {}]  }
   0x1   :  { %935 = sst [smem:[#allocation13_spill]] %s930_s0 }
   0x2   :  { %7 = vsyncpa [#allocation3], 0 }
   0x3   :  { %9 = vsyncpa [#allocation3 + $0x1], 0 }
   0x4   :  { %10 = vsyncpa [#allocation6], 0 }
   0x5   :  { %12 = vsyncpa [#allocation6 + $0x1], 0 }
   0x6   :  { %13 = vsyncpa [#allocation4], 0 }
   0x7   :  { %15 = vsyncpa [#allocation4 + $0x1], 0  ;;  %s710_s9 = smov 0   ;;  %s712_s10 = smov 0  }
   0x8   :  { %s714_s11 = smov 0   ;;  %s716_s12 = smov 0  }
   0x9   :  { %s718_s13 = smov 0   ;;  %s720_s14 = smov 0  }
   0xa   :  { %s722_s15 = smov 0   ;;  %s724_s16 = smov 0  }
   0xb   :  { %s726_s17 = smov 0   ;;  %s728_s18 = smov 0  }
   0xc   :  { %s730_s19 = smov 0   ;;  %s732_s20 = smov 0  }
   0xd LB: > { %936 = sst [smem:[#allocation11_spill]] %s689_s19  ;;  %s360_s21 = sadd.s32 4294967295, %s693_s20   ;;  %s693_s20 = sphi %s732_s20, %s21_s20   ;;  %s689_s19 = sphi %s730_s19, %s949_s19   ;;  %s685_s18 = sphi %s728_s18, %s948_s18   ;;  %s681_s17 = sphi %s726_s17, %s958_s17   ;;  %s677_s16 = sphi %s724_s16, %s957_s16   ;;  %s673_s15 = sphi %s722_s15, %s956_s15   ;;  %s669_s14 = sphi %s720_s14, %s955_s14   ;;  %s665_s13 = sphi %s718_s13, %s954_s13   ;;  %s661_s12 = sphi %s716_s12, %s953_s12   ;;  %s657_s11 = sphi %s714_s11, %s952_s11   ;;  %s653_s10 = sphi %s712_s10, %s951_s10   ;;  %s649_s9 = sphi %s710_s9, %s950_s9  }
   0xe   : > { %s361_s22 = sadd.s32 4294967294, %s693_s20   ;;  %s33_s23 = sadd.s32 1, %s689_s19 }
   0xf   : > { %s362_s24 = sshll.u32 %s689_s19, 1  ;;  %p35_p0 = scmp.ge.s32.totalorder %s33_s23, 2 }
  0x10   : > { %s44_s25 = sadd.s32 1, %s681_s17  ;;  %p51_p1 = scmp.ne.s32.totalorder %s681_s17, %s677_s16 }
  0x11   : > { %p52_p2 = scmp.eq.s32.totalorder %s693_s20, 0  ;;  %s960_s23 = smov (%p35_p0, %s33_s23), 0 }
  0x12   : > { %937 = sst [smem:[#allocation12_spill]] %s960_s23  ;;  %p57_p4 = scmp.ne.s32.totalorder %s677_s16, %s673_s15 }
  0x13   : > { %p780_p3 = por %p52_p2, %p51_p1  ;;  %s363_s27 = sshll.u32 %s960_s23, 1 }
  0x14   : > { %p786_p5 = scmp.eq.s32.totalorder %s360_s21, 0  ;;  %s39_s29 = ssub.s32 %s362_s24, %s363_s27 }
  0x15   : > { %s68_s30 = sadd.s32 1, %s362_s24  ;;  %p42_p6 = scmp.eq.s32.totalorder %s39_s29, 0 }
  0x16   : > { %p792_p7 = por %p786_p5, %p57_p4  ;;  %s70_s4 = sadd.s32 1, %s363_s27 }
  0x17   : > { %s99_s5 = ssub.s32 %s689_s19, %s960_s23  ;;  %s71_s7 = ssub.s32 %s68_s30, %s70_s4 }
  0x18   : > { %s799_s6 = scalar_select %p42_p6, %s681_s17, %s44_s25  }
  0x19   : > { %p102_p8 = scmp.eq.s32.totalorder %s99_s5, 0  ;;  %p801_p9 = scmp.eq.s32.totalorder %s71_s7, 0 }
  0x1a   : > { %s104_s15 = sadd.s32 1, %s657_s11  ;;  %p114_p10 = scmp.ne.s32.totalorder %s657_s11, %s653_s10 }
  0x1b   : > { %s807_s24 = scalar_select %p102_p8, %s657_s11, %s104_s15  }
  0x1c   : > { %p115_p11 = scmp.eq.s32.totalorder %s360_s21, 1  ;;  %p120_p12 = scmp.ne.s32.totalorder %s653_s10, %s649_s9 }
  0x1d   : > { %p121_p13 = scmp.eq.s32.totalorder %s361_s22, 1  ;;  %p401_p6 = scmp.lt.s32.totalorder %s693_s20, 2 }
  0x1e   : > { %p813_p0 = por %p115_p11, %p114_p10  ;;  %s141_s29 = sand.u32 1, %s681_s17  }
  0x1f   : > { %p818_p4 = por %p121_p13, %p120_p12  ;;  %s382_s21 = sshll.u32 %s689_s19, 3 }
  0x20   : > { %s368_s30 = sshll.u32 %s141_s29, 2  ;;  %s944_s0 = sld [smem:[#allocation13_spill]] }
  0x21   : > { %s145_s15 = scalar_lea.vmem [#allocation2], %s368_s30  ;;  %p391_p8 = pnand %p401_p6, %p780_p3 }
  0x22   : > { %s155_s23 = sshll.u32 %s145_s15, 4  ;;  %p374_p10 = scmp.ge.s32.totalorder %s693_s20, 1  ;;  %s156_s23 = int_to_ptr.vmem [resolvable:$true] %s155_s23 }
  0x23   : > { %p182_p11 = scmp.lt.s32.totalorder %s693_s20, 3  ;;  %s142_s19 = scalar_lea.sflag [#allocation3], %s141_s29 }
  0x24   : > { %s76_s4 = sadd.s32 1, %s669_s14  ;;  %p83_p13 = scmp.ne.s32.totalorder %s669_s14, %s665_s13 }
  0x25   : > { %p834_p12 = pnand %p374_p10, %p182_p11  ;;  %p89_p1 = scmp.ne.s32.totalorder %s665_s13, %s661_s12 }
  0x26   : > { %s151_s5 = scalar_lea.hbm %s944_s0, %s382_s21  ;;  %s293_s0 = scalar_lea.hbm %s931_s1, %s382_s21 }
  0x27   : > { %s153_s7 = sshll.u32 %s151_s5, 4  ;;  %s162_s5 = sand.u32 1, %s669_s14   ;;  %s154_s7 = int_to_ptr.hbm [resolvable:$true] %s153_s7 }
  0x28   : > { %393 = dma.hbm_to_vmem [thread:$0]  (!%p391_p8), %s154_s7, 64, %s156_s23, %s142_s19  }
  0x29   : > { %s842_s30 = scalar_select %p801_p9, %s669_s14, %s76_s4  }
  0x2a   : > { %p854_p3 = por %p89_p1, %p786_p5  ;;  %p85_p8 = por %p83_p13, %p52_p2 }
  0x2b   : > { %s371_s19 = sshll.u32 %s162_s5, 2  ;;  %s294_s23 = scalar_lea.hbm %s293_s0, 4 }
  0x2c   : > { %s175_s7 = sshll.u32 %s294_s23, 4  ;;  %s166_s8 = scalar_lea.vmem [#allocation5], %s371_s19  ;;  %s176_s7 = int_to_ptr.hbm [resolvable:$true] %s175_s7 }
  0x2d   : > { %s177_s4 = sshll.u32 %s166_s8, 4  ;;  %p394_p9 = pnand %p401_p6, %p85_p8  ;;  %s178_s4 = int_to_ptr.vmem [resolvable:$true] %s177_s4 }
  0x2e   : > { %s163_s12 = scalar_lea.sflag [#allocation6], %s162_s5  ;;  %186 = sbr.rel (%p834_p12) target bundleno = 72 (0x48), region = 28 }
  0x2f   : > { %396 = dma.hbm_to_vmem [thread:$0]  (!%p394_p9), %s176_s7, 64, %s178_s4, %s163_s12  }
  0x30   : > { %s188_s28 = sand.u32 (!%p834_p12), 1, %s677_s16  }
  0x31   : > { %s375_s21 = sshll.u32 (!%p834_p12), %s188_s28, 2  ;;  %s189_s15 = scalar_lea.sflag (!%p834_p12), [#allocation3], %s188_s28 }
  0x32   : > { %s192_s26 = scalar_lea.vmem (!%p834_p12), [#allocation2], %s375_s21 }
  0x33   : > { %636 = dma.done.wait (%p792_p7), %s189_s15, 64  }
  0x34   : > { %638 = vsyncadd (%p792_p7), %s189_s15, 4294967232  ;;  %s198_s0 = sand.u32 1, %s665_s13  }
  0x35   : > { %s376_s19 = sshll.u32 %s198_s0, 2  ;;  %s199_s5 = scalar_lea.sflag [#allocation6], %s198_s0 }
  0x36   : > { %s202_s23 = scalar_lea.vmem [#allocation5], %s376_s19 }
  0x37   : > { %640 = dma.done.wait (%p854_p3), %s199_s5, 64  }
  0x38   : > { %642 = vsyncadd (%p854_p3), %s199_s5, 4294967232  ;;  %s226_s22 = sand.u32 1, %s653_s10   ;;  %s379_s7 = sshll.u32 %s685_s18, 2  ;;  %v232_v0 = vld [vmem:[%s192_s26] sm:$0xf] }
  0x39   : > { %s377_s8 = sshll.u32 %s226_s22, 2  ;;  %s248_s3 = scalar_lea.hbm %s932_s2, %s379_s7  ;;  %v233_v1 = vld [vmem:[%s202_s23] sm:$0xf] }
  0x3a   : > { %s228_s28 = scalar_lea.vmem [#allocation7], %s377_s8  ;;  %s252_s15 = sshll.u32 %s248_s3, 4  ;;  %v234_v2 = vmul.f32 %v233_v1, %v232_v0  ;;  %s253_s15 = int_to_ptr.hbm [resolvable:$true] %s252_s15 }
  0x3b   : > { %s250_s21 = sshll.u32 %s228_s28, 4  ;;  %s237_s29 = scalar_lea.sflag [#allocation4], %s226_s22  ;;  %s251_s21 = int_to_ptr.vmem [resolvable:$true] %s250_s21 }
  0x3c   : > { %235 = vst [vmem:[%s228_s28] sm:$0xf] %v234_v2  ;;  %s573_s0 = sshra.s32 %s253_s15, 4  ;;  %s579_s7 = scalar_lea.hbm %s932_s2, 8  ;;  %s574_s0 = int_to_ptr.hbm [resolvable:$true] %s573_s0 }
  0x3d   : > { %s575_s19 = scalar_lea.hbm %s574_s0, 4  ;;  %p580_p1 = scmp.lt.s32.totalorder %s574_s0, %s932_s2 }
  0x3e   : > { %p576_p2 = scmp.ne.s32.totalorder %s574_s0, %s575_s19  ;;  %p581_p6 = scmp.lt.s32.totalorder %s579_s7, %s575_s19 }
  0x40   : > { %p577_p5 = pnand %p576_p2, %p813_p0  ;;  %p582_p10 = por %p581_p6, %p580_p1 }
  0x42   : > { %p578_p7 = pneg %p577_p5 }
  0x44   : > { %p583_p11 = pnand %p582_p10, %p578_p7 }
  0x46   : > { %586 = shalt.err (!%p583_p11)
}
  0x47   : > { %388 = dma.vmem_to_hbm [thread:$0]  (%p813_p0), %s251_s21, 64, %s253_s15, %s237_s29  }
  0x48 PF: > { %s264_s26 = sand.u32 1, %s649_s9   ;;  %p947_p12 = scmp.ge.s32.totalorder %s693_s20, 2 }
  0x49   : > { %s265_s23 = scalar_lea.sflag [#allocation4], %s264_s26 }
  0x4a   : > { %p398_p13 = pnand %p947_p12, %p818_p4 }
  0x4c   : > { %p399_p3 = pneg %p398_p13 }
  0x4e   : > { %644 = dma.done.wait (%p399_p3), %s265_s23, 64  }
  0x4f   : > { %646 = vsyncadd (%p399_p3), %s265_s23, 4294967232  ;;  %s21_s20 = sadd.s32 1, %s693_s20   ;;  %s948_s18 = sld [smem:[#allocation11_spill]] }
  0x50   : > { %p18_p8 = scmp.ge.s32.totalorder %s21_s20, 4   ;;  %s949_s19 = sld [smem:[#allocation12_spill]] }
  0x51   : > { %s950_s9 = smov %s653_s10  ;;  %s951_s10 = smov %s657_s11 }
  0x52   : > { %s952_s11 = smov %s807_s24  ;;  %s953_s12 = smov %s665_s13 }
  0x53   : > { %s954_s13 = smov %s669_s14  ;;  %s955_s14 = smov %s842_s30 }
  0x54   : > { %s956_s15 = smov %s677_s16  ;;  %s957_s16 = smov %s681_s17 }
  0x55   : > { %s958_s17 = smov %s799_s6  ;;  %20 = sbr.rel (!%p18_p8) target bundleno = 13 (0xd), region = 86 }
  0x5a   :  { %271 = vsyncpa [#allocation3], 1 }
  0x5b   :  { %273 = vsyncpa [#allocation3 + $0x1], 1 }
  0x5c   :  { %274 = vsyncpa [#allocation6], 1 }
  0x5d   :  { %276 = vsyncpa [#allocation6 + $0x1], 1 }
  0x5e   :  { %277 = vsyncpa [#allocation4], 1 }
  0x5f   :  { %279 = vsyncpa [#allocation4 + $0x1], 1 }

</bundles_post_ra>
